<compile_context>
chip_gen: v5e
topology: v5e:2x2
jax: 0.10.0
libtpu: 0.0.40
codegen_flags: <defaults>
</compile_context>

<pallas_src>
import jax
import jax.numpy as jnp
from jax import lax
from jax.experimental import pallas as pl
from jax.experimental.pallas import tpu as pltpu

LANES = 128
SUBLANES = 8
MAX_ROW_TILE = 2048  # (2048,128) f32 block = 1 MiB; 2 inputs x 2 buffers = 4 MiB


def _make_loss_kernel(epsilon, row_tile, blocks_per_core, valid_rows,
                      needs_row_mask):
    eps = float(epsilon)  # plain Python float -> no captured constants

    def kernel(p_ref, t_ref, o_ref):
        j = pl.program_id(1)

        @pl.when(j == 0)
        def _():
            o_ref[...] = jnp.zeros_like(o_ref)

        p = p_ref[...].astype(jnp.float32)
        t = t_ref[...].astype(jnp.float32)

        if needs_row_mask:
            # Last block may extend past the array; zero out undefined rows.
            gb = pl.program_id(0) * blocks_per_core + j
            base = gb * row_tile
            row = lax.broadcasted_iota(jnp.int32, (row_tile, LANES), 0) + base
            valid = row < valid_rows
            p = jnp.where(valid, p, 0.0)
            t = jnp.where(valid, t, 0.0)

        d = jnp.abs(p - t)                    # |p - t|
        m = (t > eps).astype(jnp.float32)     # (t > epsilon) mask
        md = m * d
        mdt = md * jnp.abs(t)

        # Vreg-shaped partial sums: reshape groups whole (8,128) tiles, and the
        # axis-0 sum is pure elementwise VPU adds (no XLU in the steady state).
        part_d = jnp.sum(d.reshape(-1, SUBLANES, LANES), axis=0)
        part_md = jnp.sum(md.reshape(-1, SUBLANES, LANES), axis=0)
        part_mdt = jnp.sum(mdt.reshape(-1, SUBLANES, LANES), axis=0)

        o_ref[0, 0, :, :] = o_ref[0, 0, :, :] + part_d
        o_ref[0, 1, :, :] = o_ref[0, 1, :, :] + part_md
        o_ref[0, 2, :, :] = o_ref[0, 2, :, :] + part_mdt

    return kernel


def ktrans_weighted_l1_loss(predictions, target, seg, *, epsilon, alpha, beta):
    """Returns (loss, loss_L1, loss_alpha, loss_beta) as float32 scalars."""
    del seg  # unused in the reference module's forward
    n_elem = predictions.size
    assert target.size == n_elem

    itemsize = jnp.dtype(predictions.dtype).itemsize

    # Flatten to a lane-dense (rows, 128) slab. Keep the original dtype in HBM
    # (cast to f32 inside the kernel). Pad with zeros only when needed to make
    # the reshape legal; zero padding contributes 0 to every sum.
    chunk = SUBLANES * LANES
    p_flat = predictions.reshape(-1)
    t_flat = target.reshape(-1)
    pad = (-n_elem) % chunk
    if pad:
        p_flat = jnp.pad(p_flat, (0, pad))
        t_flat = jnp.pad(t_flat, (0, pad))
    rows = (n_elem + pad) // LANES          # multiple of 8
    p2d = p_flat.reshape(rows, LANES)
    t2d = t_flat.reshape(rows, LANES)

    row_tile = min(MAX_ROW_TILE, rows)      # multiple of 8
    num_blocks = (rows + row_tile - 1) // row_tile
    # Split the reduction over 2 TensorCores (v7x megacore) when it divides
    # evenly; v5e/v6e simply run both p-slices on the single core.
    n_cores = 2 if (num_blocks >= 2 and num_blocks % 2 == 0) else 1
    blocks_per_core = num_blocks // n_cores
    needs_row_mask = (num_blocks * row_tile) != rows

    kernel = _make_loss_kernel(epsilon, row_tile, blocks_per_core, rows,
                               needs_row_mask)

    def in_map(p, j):
        return (p * blocks_per_core + j, 0)

    out_shape = jax.ShapeDtypeStruct((n_cores, 3, SUBLANES, LANES), jnp.float32)
    out_bytes = n_cores * 3 * SUBLANES * LANES * 4

    cost = pl.CostEstimate(
        flops=6 * n_elem,
        transcendentals=0,
        bytes_accessed=2 * n_elem * itemsize + out_bytes,
    )

    sums = pl.pallas_call(
        kernel,
        out_shape=out_shape,
        grid_spec=pltpu.PrefetchScalarGridSpec(
            num_scalar_prefetch=0,
            grid=(n_cores, blocks_per_core),
            in_specs=[
                pl.BlockSpec((row_tile, LANES), in_map),
                pl.BlockSpec((row_tile, LANES), in_map),
            ],
            out_specs=pl.BlockSpec((1, 3, SUBLANES, LANES),
                                   lambda p, j: (p, 0, 0, 0)),
        ),
        compiler_params=pltpu.CompilerParams(
            dimension_semantics=("parallel", "arbitrary")),
        cost_estimate=cost,
    )(p2d, t2d)

    # Final tiny cross-lane reduction done outside the kernel.
    totals = jnp.sum(sums, axis=(0, 2, 3))   # [sum d, sum m*d, sum m*d*|t|]
    inv_n = 1.0 / n_elem
    loss_l1 = totals[0] * inv_n
    loss_alpha = totals[1] * (abs(alpha) * inv_n)
    loss_beta = totals[2] * (abs(beta) * inv_n)
    loss = loss_l1 + loss_alpha + loss_beta
    return loss, loss_l1, loss_alpha, loss_beta


def _reference(predictions, target, epsilon, alpha, beta):
    p = predictions.astype(jnp.float32)
    t = target.astype(jnp.float32)
    m = (t > epsilon).astype(jnp.float32)
    l_b = jnp.mean(jnp.abs(p * m * (t * beta) - t * m * (t * beta)))
    l_a = jnp.mean(jnp.abs(p * m * alpha - t * m * alpha))
    l_1 = jnp.mean(jnp.abs(p - t))
    return l_1 + l_a + l_b


if __name__ == "__main__":
    # Loss hyperparameters (module __init__ args), fixed deterministically.
    EPSILON, ALPHA, BETA = 0.05, 2.0, 10.0

    key = jax.random.PRNGKey(0)
    k1, k2, k3 = jax.random.split(key, 3)
    # NCHW: batch=2, channels=4, spatial=16x16
    predictions = jax.random.uniform(k1, (2, 4, 16, 16), dtype=jnp.float32)
    target = jax.random.uniform(k2, (2, 4, 16, 16), dtype=jnp.float32)
    seg = (jax.random.uniform(k3, (2, 4, 16, 16)) > 0.5).astype(jnp.float32)

    loss, l1, la, lb = ktrans_weighted_l1_loss(
        predictions, target, seg, epsilon=EPSILON, alpha=ALPHA, beta=BETA)
    loss = jax.block_until_ready(loss)

    ref = _reference(predictions, target, EPSILON, ALPHA, BETA)
    assert jnp.allclose(loss, ref, rtol=1e-4, atol=1e-6), (loss, ref)

    # TODO(synk): the PyTorch forward also print()s the three sub-losses; we
    # return them instead of printing to keep the required exact output.
    print("KERNEL_OK")
</pallas_src>

<mosaic_0001>
module attributes {stable_mosaic.version = 11 : i64} {
  func.func @kernel(%arg0: i32, %arg1: i32, %arg2: memref<16x128xf32, #tpu.memory_space<vmem>>, %arg3: memref<16x128xf32, #tpu.memory_space<vmem>>, %arg4: memref<1x3x8x128xf32, #tpu.memory_space<vmem>>) attributes {dimension_semantics = [#tpu.dimension_semantics<parallel>, #tpu.dimension_semantics<arbitrary>], iteration_bounds = array<i64: 1, 1>, scalar_prefetch = 0 : i64, scratch_operands = 0 : i64, tpu.core_type = #tpu.core_type<tc>, window_params = [{transform_indices = @transform_0, window_bounds = array<i64: 16, 128>}, {transform_indices = @transform_1, window_bounds = array<i64: 16, 128>}, {transform_indices = @transform_2, window_bounds = array<i64: 1, 3, 8, 128>}]} {
    %c0_i32 = arith.constant 0 : i32
    %0 = arith.cmpi eq, %arg1, %c0_i32 : i32
    %1 = arith.extui %0 : i1 to i32
    %c0_i32_0 = arith.constant 0 : i32
    %2 = arith.cmpi ne, %1, %c0_i32_0 : i32
    scf.if %2 {
      %cst_29 = arith.constant 0.000000e+00 : f32
      %38 = vector.broadcast %cst_29 : f32 to vector<1x3x8x128xf32>
      %c0_30 = arith.constant 0 : index
      %c0_31 = arith.constant 0 : index
      %c0_32 = arith.constant 0 : index
      %c0_33 = arith.constant 0 : index
      %39 = vector.load %arg4[%c0_30, %c0_31, %c0_32, %c0_33] : memref<1x3x8x128xf32, #tpu.memory_space<vmem>>, vector<1x3x8x128xf32>
      tpu.vector_store %arg4[%c0_30, %c0_31, %c0_32, %c0_33], %38 {strides = array<i32>} : memref<1x3x8x128xf32, #tpu.memory_space<vmem>>, vector<1x3x8x128xf32>,
    } else {
    }
    %c0 = arith.constant 0 : index
    %c0_1 = arith.constant 0 : index
    %3 = vector.load %arg2[%c0, %c0_1] : memref<16x128xf32, #tpu.memory_space<vmem>>, vector<16x128xf32>
    %c0_2 = arith.constant 0 : index
    %c0_3 = arith.constant 0 : index
    %4 = vector.load %arg3[%c0_2, %c0_3] : memref<16x128xf32, #tpu.memory_space<vmem>>, vector<16x128xf32>
    %5 = arith.subf %3, %4 : vector<16x128xf32>
    %6 = math.absf %5 : vector<16x128xf32>
    %cst = arith.constant 5.000000e-02 : f32
    %7 = vector.broadcast %cst : f32 to vector<16x128xf32>
    %8 = arith.cmpf ogt, %4, %7 : vector<16x128xf32>
    %9 = arith.extui %8 : vector<16x128xi1> to vector<16x128xi32>
    %10 = arith.sitofp %9 : vector<16x128xi32> to vector<16x128xf32>
    %11 = arith.mulf %10, %6 : vector<16x128xf32>
    %12 = math.absf %4 : vector<16x128xf32>
    %13 = arith.mulf %11, %12 : vector<16x128xf32>
    %14 = vector.shape_cast %6 : vector<16x128xf32> to vector<2x8x128xf32>
    %cst_4 = arith.constant dense<0.000000e+00> : vector<8x128xf32>
    %15 = vector.multi_reduction <add>, %14, %cst_4 [0] : vector<2x8x128xf32> to vector<8x128xf32>
    %16 = vector.shape_cast %11 : vector<16x128xf32> to vector<2x8x128xf32>
    %cst_5 = arith.constant dense<0.000000e+00> : vector<8x128xf32>
    %17 = vector.multi_reduction <add>, %16, %cst_5 [0] : vector<2x8x128xf32> to vector<8x128xf32>
    %18 = vector.shape_cast %13 : vector<16x128xf32> to vector<2x8x128xf32>
    %cst_6 = arith.constant dense<0.000000e+00> : vector<8x128xf32>
    %19 = vector.multi_reduction <add>, %18, %cst_6 [0] : vector<2x8x128xf32> to vector<8x128xf32>
    %c0_7 = arith.constant 0 : index
    %c0_8 = arith.constant 0 : index
    %c0_9 = arith.constant 0 : index
    %c0_10 = arith.constant 0 : index
    %20 = vector.load %arg4[%c0_7, %c0_8, %c0_9, %c0_10] : memref<1x3x8x128xf32, #tpu.memory_space<vmem>>, vector<1x1x8x128xf32>
    %21 = vector.shape_cast %20 : vector<1x1x8x128xf32> to vector<8x128xf32>
    %22 = arith.addf %21, %15 : vector<8x128xf32>
    %c0_11 = arith.constant 0 : index
    %c0_12 = arith.constant 0 : index
    %c0_13 = arith.constant 0 : index
    %c0_14 = arith.constant 0 : index
    %23 = vector.load %arg4[%c0_11, %c0_12, %c0_13, %c0_14] : memref<1x3x8x128xf32, #tpu.memory_space<vmem>>, vector<1x1x8x128xf32>
    %24 = vector.shape_cast %23 : vector<1x1x8x128xf32> to vector<8x128xf32>
    %25 = vector.shape_cast %22 : vector<8x128xf32> to vector<1x1x8x128xf32>
    tpu.vector_store %arg4[%c0_11, %c0_12, %c0_13, %c0_14], %25 {strides = array<i32>} : memref<1x3x8x128xf32, #tpu.memory_space<vmem>>, vector<1x1x8x128xf32>,
    %c0_15 = arith.constant 0 : index
    %c1 = arith.constant 1 : index
    %c0_16 = arith.constant 0 : index
    %c0_17 = arith.constant 0 : index
    %26 = vector.load %arg4[%c0_15, %c1, %c0_16, %c0_17] : memref<1x3x8x128xf32, #tpu.memory_space<vmem>>, vector<1x1x8x128xf32>
    %27 = vector.shape_cast %26 : vector<1x1x8x128xf32> to vector<8x128xf32>
    %28 = arith.addf %27, %17 : vector<8x128xf32>
    %c0_18 = arith.constant 0 : index
    %c1_19 = arith.constant 1 : index
    %c0_20 = arith.constant 0 : index
    %c0_21 = arith.constant 0 : index
    %29 = vector.load %arg4[%c0_18, %c1_19, %c0_20, %c0_21] : memref<1x3x8x128xf32, #tpu.memory_space<vmem>>, vector<1x1x8x128xf32>
    %30 = vector.shape_cast %29 : vector<1x1x8x128xf32> to vector<8x128xf32>
    %31 = vector.shape_cast %28 : vector<8x128xf32> to vector<1x1x8x128xf32>
    tpu.vector_store %arg4[%c0_18, %c1_19, %c0_20, %c0_21], %31 {strides = array<i32>} : memref<1x3x8x128xf32, #tpu.memory_space<vmem>>, vector<1x1x8x128xf32>,
    %c0_22 = arith.constant 0 : index
    %c2 = arith.constant 2 : index
    %c0_23 = arith.constant 0 : index
    %c0_24 = arith.constant 0 : index
    %32 = vector.load %arg4[%c0_22, %c2, %c0_23, %c0_24] : memref<1x3x8x128xf32, #tpu.memory_space<vmem>>, vector<1x1x8x128xf32>
    %33 = vector.shape_cast %32 : vector<1x1x8x128xf32> to vector<8x128xf32>
    %34 = arith.addf %33, %19 : vector<8x128xf32>
    %c0_25 = arith.constant 0 : index
    %c2_26 = arith.constant 2 : index
    %c0_27 = arith.constant 0 : index
    %c0_28 = arith.constant 0 : index
    %35 = vector.load %arg4[%c0_25, %c2_26, %c0_27, %c0_28] : memref<1x3x8x128xf32, #tpu.memory_space<vmem>>, vector<1x1x8x128xf32>
    %36 = vector.shape_cast %35 : vector<1x1x8x128xf32> to vector<8x128xf32>
    %37 = vector.shape_cast %34 : vector<8x128xf32> to vector<1x1x8x128xf32>
    tpu.vector_store %arg4[%c0_25, %c2_26, %c0_27, %c0_28], %37 {strides = array<i32>} : memref<1x3x8x128xf32, #tpu.memory_space<vmem>>, vector<1x1x8x128xf32>,
    return
  }
  func.func @transform_0(%arg0: i32, %arg1: i32) -> (i32, i32) {
    %c1_i32 = arith.constant 1 : i32
    %0 = arith.muli %arg0, %c1_i32 : i32
    %1 = arith.addi %0, %arg1 : i32
    %c0_i32 = arith.constant 0 : i32
    %c0_i32_0 = arith.constant 0 : i32
    return %1, %c0_i32 : i32, i32
  }
  func.func @transform_1(%arg0: i32, %arg1: i32) -> (i32, i32) {
    %c1_i32 = arith.constant 1 : i32
    %0 = arith.muli %arg0, %c1_i32 : i32
    %1 = arith.addi %0, %arg1 : i32
    %c0_i32 = arith.constant 0 : i32
    %c0_i32_0 = arith.constant 0 : i32
    return %1, %c0_i32 : i32, i32
  }
  func.func @transform_2(%arg0: i32, %arg1: i32) -> (i32, i32, i32, i32) {
    %c0_i32 = arith.constant 0 : i32
    %c0_i32_0 = arith.constant 0 : i32
    %c0_i32_1 = arith.constant 0 : i32
    %c0_i32_2 = arith.constant 0 : i32
    return %arg0, %c0_i32, %c0_i32_0, %c0_i32_1 : i32, i32, i32, i32
  }
}

</mosaic_0001>

<bundles_post_ra>
// kernel: tpu_custom_call.1
= control target key start
LH: loop header
LB: loop body
LE: loop exit
PB: predicated region body
PF: predicated region fallthrough
CT: control target
= control target key end

     0   :  { %7 = vsyncpa [#allocation3], 0  ;;  %s242_s0 = inlined_call_operand.hbm [shape: f32[16,128], index: 0, kind: input, shape index: {}]   ;;  %s243_s1 = inlined_call_operand.hbm [shape: f32[16,128], index: 1, kind: input, shape index: {}]   ;;  %s244_s2 = inlined_call_operand.hbm [shape: f32[1,3,8,128], index: 2, kind: output, shape index: {}]  }
   0x1   :  { %8 = vsyncpa [#allocation6], 0 }
   0x2   :  { %9 = vsyncpa [#allocation4], 0  ;;  %s18_s11 = sshll.u32 %s242_s0, 4  ;;  %s203_s12 = smov [#allocation2]   ;;  %s19_s11 = int_to_ptr.hbm [resolvable:$true] %s18_s11 }
   0x3   :  { %s20_s13 = sshll.u32 %s203_s12, 4  ;;  %s35_s16 = sshll.u32 %s243_s1, 4  ;;  %s21_s13 = int_to_ptr.vmem [resolvable:$true] %s20_s13  ;;  %s36_s16 = int_to_ptr.hbm [resolvable:$true] %s35_s16 }
   0x4   :  { %s204_s17 = smov 128   ;;  %s205_s18 = smov 8  }
   0x5   :  { %26 = dma.hbm_to_vmem [thread:$0]  %s19_s11, 256, %s21_s13, [#allocation3], %s204_s17, %s204_s17, %s205_s18  }
   0x6   :  { %s206_s19 = smov [#allocation5]  }
   0x7   :  { %s37_s20 = sshll.u32 %s206_s19, 4  ;;  %s38_s20 = int_to_ptr.vmem [resolvable:$true] %s37_s20 }
   0x8   :  { %43 = dma.hbm_to_vmem [thread:$0]  %s36_s16, 256, %s38_s20, [#allocation6], %s204_s17, %s204_s17, %s205_s18  }
   0x9   :  { %197 = dma.done.wait [#allocation3], 256  }
   0xa   :  { %198 = vsyncadd [#allocation3], 4294967040 }
   0xb   :  { %199 = dma.done.wait [#allocation6], 256  }
   0xc   :  { %200 = vsyncadd [#allocation6], 4294967040  ;;  %v63_v0 = vld [vmem:[#allocation2] sm:$0xff]  ;;  %v64_v1 = vld [vmem:[#allocation2 + $0x8] sm:$0xff]  ;;  %v207_v6 = vmov 0.0   ;;  %s208_s0 = smov [#allocation7]  }
   0xd   :  { %v65_v2 = vld [vmem:[#allocation5] sm:$0xff]  ;;  %v66_v3 = vld [vmem:[#allocation5 + $0x8] sm:$0xff]  ;;  %s101_s1 = sshll.u32 %s208_s0, 4  ;;  %s103_s23 = sshll.u32 %s244_s2, 4  ;;  %s102_s1 = int_to_ptr.vmem [resolvable:$true] %s101_s1  ;;  %s104_s23 = int_to_ptr.hbm [resolvable:$true] %s103_s23 }
   0xe   :  { %v67_v4 = vsub.f32 %v63_v0, %v65_v2  ;;  %vm71_vm0 = vcmp.gt.f32.partialorder %v65_v2, 0.05  ;;  %v68_v5 = vsub.f32 %v64_v1, %v66_v3  ;;  %vm72_vm1 = vcmp.gt.f32.partialorder %v66_v3, 0.05 }
   0xf   :  { %v117_v7 = vsel %vm71_vm0, 1.0, %v207_v6  ;;  %v118_v9 = vsel %vm72_vm1, 1.0, %v207_v6  ;;  %v79_v10 = vand.u32 2147483647, %v65_v2  ;;  %v80_v12 = vand.u32 2147483647, %v66_v3 }
  0x10   :  { %v69_v8 = vand.u32 2147483647, %v67_v4  ;;  %v70_v11 = vand.u32 2147483647, %v68_v5 }
  0x12   :  { %v77_v13 = vmul.f32 %v117_v7, %v69_v8  ;;  %v83_v14 = vadd.f32 %v70_v11, %v69_v8  ;;  %v78_v15 = vmul.f32 %v118_v9, %v70_v11 }
  0x14   :  { %v81_v16 = vmul.f32 %v79_v10, %v77_v13  ;;  %v84_v17 = vadd.f32 %v78_v15, %v77_v13  ;;  %v82_v18 = vmul.f32 %v80_v12, %v78_v15  ;;  %88 = vst [vmem:[#allocation7] sm:$0xff] %v83_v14 }
  0x16   :  { %v85_v19 = vadd.f32 %v82_v18, %v81_v16  ;;  %92 = vst [vmem:[#allocation7 + $0x8] sm:$0xff] %v84_v17 }
  0x18   :  { %96 = vst [vmem:[#allocation7 + $0x10] sm:$0xff] %v85_v19 }
  0x19   :  { %109 = dma.vmem_to_hbm [thread:$0]  %s102_s1, 384, %s104_s23, [#allocation4], %s204_s17, %s204_s17, %s205_s18  }
  0x1a   :  { %201 = dma.done.wait [#allocation4], 384  }
  0x1b   :  { %202 = vsyncadd [#allocation4], 4294966912 }
  0x1c   :  { %114 = vsyncpa [#allocation3], 1 }
  0x1d   :  { %115 = vsyncpa [#allocation6], 1 }
  0x1e   :  { %116 = vsyncpa [#allocation4], 1 }

</bundles_post_ra>
